<compile_context>
chip_gen: v7x
topology: tpu7x:2x2x1
jax: 0.10.0
libtpu: 0.0.40
codegen_flags: <defaults>
</compile_context>

<pallas_src>
import jax
import jax.numpy as jnp
from jax.experimental import pallas as pl
from jax.experimental.pallas import tpu as pltpu

BN_EPS = 1e-5
LANE = 128
MAX_TILE_B = 512  # sized to fit v7x's 64 MiB VMEM comfortably (also fine on v5e/v6e)


def _round_up(n, m):
    return ((n + m - 1) // m) * m


def _fcn_kernel(x_ref, w1_ref, b1_ref, w2_ref, b2_ref, w3_ref, b3_ref, o_ref):
    # Layer 1: Linear(input_size -> Hp) + ReLU   (bf16 inputs, f32 accumulate)
    x = x_ref[...]
    h = jnp.dot(x, w1_ref[...], preferred_element_type=jnp.float32) + b1_ref[...]
    h = jnp.maximum(h, 0.0)

    # BatchNorm1d (eval mode) is folded into w2/b2 on the host.

    # Layer 2: Linear(Hp -> Hp) + Sigmoid
    h = jnp.dot(h.astype(jnp.bfloat16), w2_ref[...],
                preferred_element_type=jnp.float32) + b2_ref[...]
    h = jax.nn.sigmoid(h)

    # Dropout(0.1) -> identity in eval mode.

    # Final classifier: Linear(Hp -> Cp)
    out = jnp.dot(h.astype(jnp.bfloat16), w3_ref[...],
                  preferred_element_type=jnp.float32) + b3_ref[...]
    o_ref[...] = out.astype(o_ref.dtype)


def fcn_forward(x, kernel_params, num_classes, *, tile_b=MAX_TILE_B):
    """x: (B, C, H, W) float32 (NCHW as in the PyTorch module). Returns (B, num_classes)."""
    B = x.shape[0]
    x_flat = x.reshape(B, -1).astype(jnp.bfloat16)  # x.view(x.size(0), -1), halved DMA bytes
    in_features = x_flat.shape[1]

    w1, b1, w2, b2, w3, b3 = kernel_params
    hp = w1.shape[1]   # lane-padded hidden (multiple of 128)
    cp = w3.shape[1]   # lane-padded classes (multiple of 128)

    # Batch tile: multiple of 8 sublanes, capped so tiles stay small in VMEM.
    tile_b = min(tile_b, _round_up(B, 8))
    b_padded = _round_up(B, tile_b)
    if b_padded != B:
        x_flat = jnp.pad(x_flat, ((0, b_padded - B), (0, 0)))

    const = lambda i: (0, 0)   # weights/biases resident across grid steps
    out = pl.pallas_call(
        _fcn_kernel,
        out_shape=jax.ShapeDtypeStruct((b_padded, cp), jnp.float32),
        grid=(pl.cdiv(b_padded, tile_b),),
        in_specs=[
            pl.BlockSpec((tile_b, in_features), lambda i: (i, 0)),
            pl.BlockSpec((in_features, hp), const),
            pl.BlockSpec((1, hp), const),
            pl.BlockSpec((hp, hp), const),
            pl.BlockSpec((1, hp), const),
            pl.BlockSpec((hp, cp), const),
            pl.BlockSpec((1, cp), const),
        ],
        out_specs=pl.BlockSpec((tile_b, cp), lambda i: (i, 0)),
        compiler_params=pltpu.CompilerParams(dimension_semantics=("parallel",)),
    )(x_flat, w1, b1, w2, b2, w3, b3)

    return out[:B, :num_classes]


def init_params(key, input_size, hidden, num_classes):
    """Raw f32 params matching PyTorch defaults.
    Linear: U(-1/sqrt(fan_in), 1/sqrt(fan_in)); weights stored (in, out) = W^T.
    BatchNorm1d: gamma=1, beta=0, running_mean=0, running_var=1."""
    def linear(k, fan_in, fan_out):
        kw, kb = jax.random.split(k)
        bound = 1.0 / jnp.sqrt(fan_in)
        w = jax.random.uniform(kw, (fan_in, fan_out), jnp.float32, -bound, bound)
        b = jax.random.uniform(kb, (fan_out,), jnp.float32, -bound, bound)
        return w, b

    k1, k2, k3 = jax.random.split(key, 3)
    w1, b1 = linear(k1, input_size, hidden)
    w2, b2 = linear(k2, hidden, hidden)
    w3, b3 = linear(k3, hidden, num_classes)

    gamma = jnp.ones((hidden,), jnp.float32)
    beta = jnp.zeros((hidden,), jnp.float32)
    mean = jnp.zeros((hidden,), jnp.float32)
    var = jnp.ones((hidden,), jnp.float32)

    return (w1, b1, gamma, beta, mean, var, w2, b2, w3, b3)


def prepare_kernel_params(raw_params):
    """Fold eval-mode BN into layer 2, pad lane dims to 128, cast weights to bf16."""
    w1, b1, gamma, beta, mean, var, w2, b2, w3, b3 = raw_params
    in_features, hidden = w1.shape
    num_classes = w3.shape[1]

    # BN folding: (h - mean) * gamma/sqrt(var+eps) + beta == h*scale + shift
    scale = gamma * jax.lax.rsqrt(var + BN_EPS)
    shift = beta - mean * scale
    w2f = scale[:, None] * w2
    b2f = shift @ w2 + b2

    hp = _round_up(hidden, LANE)
    cp = _round_up(num_classes, LANE)

    def pad_w(w, rows, cols):
        return jnp.pad(w, ((0, rows - w.shape[0]), (0, cols - w.shape[1])))

    def pad_b(b, n):
        return jnp.pad(b, (0, n - b.shape[0])).reshape(1, n)

    # Zero-padded rows of w2/w3 are mandatory: pad lanes of the sigmoid output
    # are 0.5 and must contribute nothing to the logits.
    w1p = pad_w(w1, in_features, hp).astype(jnp.bfloat16)
    w2p = pad_w(w2f, hp, hp).astype(jnp.bfloat16)
    w3p = pad_w(w3, hp, cp).astype(jnp.bfloat16)
    b1p = pad_b(b1, hp).astype(jnp.float32)
    b2p = pad_b(b2f, hp).astype(jnp.float32)
    b3p = pad_b(b3, cp).astype(jnp.float32)

    return (w1p, b1p, w2p, b2p, w3p, b3p), num_classes


def reference_forward(x, raw_params):
    """Pure-JAX f32 reference with the original (un-folded, un-padded) eval semantics."""
    w1, b1, gamma, beta, mean, var, w2, b2, w3, b3 = raw_params
    h = x.reshape(x.shape[0], -1)
    h = jnp.maximum(h @ w1 + b1, 0.0)
    h = (h - mean) * jax.lax.rsqrt(var + BN_EPS) * gamma + beta
    h = jax.nn.sigmoid(h @ w2 + b2)
    return h @ w3 + b3


if __name__ == "__main__":
    key = jax.random.PRNGKey(0)
    k_x, k_p = jax.random.split(key)

    B, C, H, W = 16, 4, 4, 4          # input_size = 4*4*4 = 64, batch multiple of 8
    hidden = 32
    num_classes = 10

    x = jax.random.normal(k_x, (B, C, H, W), jnp.float32)
    raw_params = init_params(k_p, C * H * W, hidden, num_classes)
    kernel_params, nc = prepare_kernel_params(raw_params)

    out = fcn_forward(x, kernel_params, nc)
    out = jax.block_until_ready(out)

    ref = reference_forward(x, raw_params)
    assert out.shape == (B, num_classes)
    max_err = float(jnp.max(jnp.abs(out - ref)))
    assert jnp.allclose(out, ref, atol=3e-2, rtol=3e-2), (
        f"Pallas output mismatch vs reference (max abs err {max_err})")

    print("KERNEL_OK")
</pallas_src>

<mosaic_0001>
module attributes {stable_mosaic.version = 11 : i64} {
  func.func @_fcn_kernel(%arg0: i32, %arg1: memref<16x64xbf16, #tpu.memory_space<vmem>>, %arg2: memref<64x128xbf16, #tpu.memory_space<vmem>>, %arg3: memref<1x128xf32, #tpu.memory_space<vmem>>, %arg4: memref<128x128xbf16, #tpu.memory_space<vmem>>, %arg5: memref<1x128xf32, #tpu.memory_space<vmem>>, %arg6: memref<128x128xbf16, #tpu.memory_space<vmem>>, %arg7: memref<1x128xf32, #tpu.memory_space<vmem>>, %arg8: memref<16x128xf32, #tpu.memory_space<vmem>>) attributes {dimension_semantics = [#tpu.dimension_semantics<parallel>], iteration_bounds = array<i64: 1>, scalar_prefetch = 0 : i64, scratch_operands = 0 : i64, tpu.core_type = #tpu.core_type<tc>, window_params = [{transform_indices = @transform_0, window_bounds = array<i64: 16, 64>}, {pipeline_mode = #tpu.pipeline_mode<synchronous>, transform_indices = @transform_1, window_bounds = array<i64: 64, 128>}, {pipeline_mode = #tpu.pipeline_mode<synchronous>, transform_indices = @transform_2, window_bounds = array<i64: 1, 128>}, {pipeline_mode = #tpu.pipeline_mode<synchronous>, transform_indices = @transform_3, window_bounds = array<i64: 128, 128>}, {pipeline_mode = #tpu.pipeline_mode<synchronous>, transform_indices = @transform_4, window_bounds = array<i64: 1, 128>}, {pipeline_mode = #tpu.pipeline_mode<synchronous>, transform_indices = @transform_5, window_bounds = array<i64: 128, 128>}, {pipeline_mode = #tpu.pipeline_mode<synchronous>, transform_indices = @transform_6, window_bounds = array<i64: 1, 128>}, {transform_indices = @transform_7, window_bounds = array<i64: 16, 128>}]} {
    %c0 = arith.constant 0 : index
    %c0_0 = arith.constant 0 : index
    %0 = vector.load %arg1[%c0, %c0_0] : memref<16x64xbf16, #tpu.memory_space<vmem>>, vector<16x64xbf16>
    %c0_1 = arith.constant 0 : index
    %c0_2 = arith.constant 0 : index
    %1 = vector.load %arg2[%c0_1, %c0_2] : memref<64x128xbf16, #tpu.memory_space<vmem>>, vector<64x128xbf16>
    %cst = arith.constant dense<0.000000e+00> : vector<16x128xf32>
    %2 = tpu.matmul %0, %1, %cst {dimension_numbers = #tpu.dot_dimension_numbers<[1], [0], [0], [1], [0, 0, 1, 1], [], []>} : vector<16x64xbf16>, vector<64x128xbf16>, vector<16x128xf32> -> vector<16x128xf32>
    %c0_3 = arith.constant 0 : index
    %c0_4 = arith.constant 0 : index
    %3 = vector.load %arg3[%c0_3, %c0_4] : memref<1x128xf32, #tpu.memory_space<vmem>>, vector<1x128xf32>
    %4 = vector.broadcast %3 : vector<1x128xf32> to vector<16x128xf32>
    %5 = arith.addf %2, %4 : vector<16x128xf32>
    %cst_5 = arith.constant 0.000000e+00 : f32
    %6 = vector.broadcast %cst_5 : f32 to vector<16x128xf32>
    %7 = arith.maximumf %5, %6 : vector<16x128xf32>
    %8 = arith.truncf %7 : vector<16x128xf32> to vector<16x128xbf16>
    %c0_6 = arith.constant 0 : index
    %c0_7 = arith.constant 0 : index
    %9 = vector.load %arg4[%c0_6, %c0_7] : memref<128x128xbf16, #tpu.memory_space<vmem>>, vector<128x128xbf16>
    %cst_8 = arith.constant dense<0.000000e+00> : vector<16x128xf32>
    %10 = tpu.matmul %8, %9, %cst_8 {dimension_numbers = #tpu.dot_dimension_numbers<[1], [0], [0], [1], [0, 0, 1, 1], [], []>} : vector<16x128xbf16>, vector<128x128xbf16>, vector<16x128xf32> -> vector<16x128xf32>
    %c0_9 = arith.constant 0 : index
    %c0_10 = arith.constant 0 : index
    %11 = vector.load %arg5[%c0_9, %c0_10] : memref<1x128xf32, #tpu.memory_space<vmem>>, vector<1x128xf32>
    %12 = vector.broadcast %11 : vector<1x128xf32> to vector<16x128xf32>
    %13 = arith.addf %10, %12 : vector<16x128xf32>
    %14 = arith.negf %13 : vector<16x128xf32>
    %15 = math.exp %14 : vector<16x128xf32>
    %cst_11 = arith.constant 1.000000e+00 : f32
    %16 = vector.broadcast %cst_11 : f32 to vector<16x128xf32>
    %17 = arith.addf %16, %15 : vector<16x128xf32>
    %18 = arith.divf %16, %17 : vector<16x128xf32>
    %19 = arith.truncf %18 : vector<16x128xf32> to vector<16x128xbf16>
    %c0_12 = arith.constant 0 : index
    %c0_13 = arith.constant 0 : index
    %20 = vector.load %arg6[%c0_12, %c0_13] : memref<128x128xbf16, #tpu.memory_space<vmem>>, vector<128x128xbf16>
    %cst_14 = arith.constant dense<0.000000e+00> : vector<16x128xf32>
    %21 = tpu.matmul %19, %20, %cst_14 {dimension_numbers = #tpu.dot_dimension_numbers<[1], [0], [0], [1], [0, 0, 1, 1], [], []>} : vector<16x128xbf16>, vector<128x128xbf16>, vector<16x128xf32> -> vector<16x128xf32>
    %c0_15 = arith.constant 0 : index
    %c0_16 = arith.constant 0 : index
    %22 = vector.load %arg7[%c0_15, %c0_16] : memref<1x128xf32, #tpu.memory_space<vmem>>, vector<1x128xf32>
    %23 = vector.broadcast %22 : vector<1x128xf32> to vector<16x128xf32>
    %24 = arith.addf %21, %23 : vector<16x128xf32>
    %c0_17 = arith.constant 0 : index
    %c0_18 = arith.constant 0 : index
    %25 = vector.load %arg8[%c0_17, %c0_18] : memref<16x128xf32, #tpu.memory_space<vmem>>, vector<16x128xf32>
    tpu.vector_store %arg8[%c0_17, %c0_18], %24 {strides = array<i32>} : memref<16x128xf32, #tpu.memory_space<vmem>>, vector<16x128xf32>,
    return
  }
  func.func @transform_0(%arg0: i32) -> (i32, i32) {
    %c0_i32 = arith.constant 0 : i32
    %c0_i32_0 = arith.constant 0 : i32
    return %arg0, %c0_i32 : i32, i32
  }
  func.func @transform_1(%arg0: i32) -> (i32, i32) {
    %c0_i32 = arith.constant 0 : i32
    %c0_i32_0 = arith.constant 0 : i32
    %c0_i32_1 = arith.constant 0 : i32
    return %c0_i32, %c0_i32_0 : i32, i32
  }
  func.func @transform_2(%arg0: i32) -> (i32, i32) {
    %c0_i32 = arith.constant 0 : i32
    %c0_i32_0 = arith.constant 0 : i32
    %c0_i32_1 = arith.constant 0 : i32
    return %c0_i32, %c0_i32_0 : i32, i32
  }
  func.func @transform_3(%arg0: i32) -> (i32, i32) {
    %c0_i32 = arith.constant 0 : i32
    %c0_i32_0 = arith.constant 0 : i32
    %c0_i32_1 = arith.constant 0 : i32
    return %c0_i32, %c0_i32_0 : i32, i32
  }
  func.func @transform_4(%arg0: i32) -> (i32, i32) {
    %c0_i32 = arith.constant 0 : i32
    %c0_i32_0 = arith.constant 0 : i32
    %c0_i32_1 = arith.constant 0 : i32
    return %c0_i32, %c0_i32_0 : i32, i32
  }
  func.func @transform_5(%arg0: i32) -> (i32, i32) {
    %c0_i32 = arith.constant 0 : i32
    %c0_i32_0 = arith.constant 0 : i32
    %c0_i32_1 = arith.constant 0 : i32
    return %c0_i32, %c0_i32_0 : i32, i32
  }
  func.func @transform_6(%arg0: i32) -> (i32, i32) {
    %c0_i32 = arith.constant 0 : i32
    %c0_i32_0 = arith.constant 0 : i32
    %c0_i32_1 = arith.constant 0 : i32
    return %c0_i32, %c0_i32_0 : i32, i32
  }
  func.func @transform_7(%arg0: i32) -> (i32, i32) {
    %c0_i32 = arith.constant 0 : i32
    %c0_i32_0 = arith.constant 0 : i32
    return %arg0, %c0_i32 : i32, i32
  }
}

</mosaic_0001>

<bundles_post_ra>
// kernel: tpu_custom_call.1
= control target key start
LH: loop header
LB: loop body
LE: loop exit
PB: predicated region body
PF: predicated region fallthrough
CT: control target
= control target key end

     0   :  { %12 = vsyncpa [#allocation3], 0  ;;  %s867_s0 = inlined_call_operand.hbm [shape: bf16[16,64], index: 0, kind: input, shape index: {}]   ;;  %s868_s1 = inlined_call_operand.hbm [shape: bf16[64,128], index: 1, kind: input, shape index: {}]   ;;  %s869_s2 = inlined_call_operand.vmem [shape: f32[1,128], index: 2, kind: input, shape index: {}]   ;;  %s870_s3 = inlined_call_operand.hbm [shape: bf16[128,128], index: 3, kind: input, shape index: {}]   ;;  %s871_s4 = inlined_call_operand.vmem [shape: f32[1,128], index: 4, kind: input, shape index: {}]   ;;  %s872_s5 = inlined_call_operand.hbm [shape: bf16[128,128], index: 5, kind: input, shape index: {}]   ;;  %s873_s6 = inlined_call_operand.vmem [shape: f32[1,128], index: 6, kind: input, shape index: {}]   ;;  %s874_s7 = inlined_call_operand.hbm [shape: f32[16,128], index: 7, kind: output, shape index: {}]  }
   0x1   :  { %13 = vsyncpa [#allocation6], 0 }
   0x2   :  { %14 = vsyncpa [#allocation9], 0 }
   0x3   :  { %15 = vsyncpa [#allocation4], 0  ;;  %s695_s24 = smov [#allocation5]   ;;  %s696_s26 = smov [#allocation2]  }
   0x4   :  { %s33_s25 = sshll.u32 %s695_s24, 4  ;;  %s21_s27 = sshll.u32 %s696_s26, 4  ;;  %s34_s25 = int_to_ptr.vmem [resolvable:$true] %s33_s25  ;;  %s746_s27 = int_to_ptr.vmem [resolvable:$true] %s21_s27 }
   0x5   :  { %s577_s30 = scalar_lea.hbm %s868_s1, 512 }
   0x6   :  { %p578_p0 = scmp.ne.s32.totalorder %s868_s1, %s577_s30  ;;  %p581_p1 = scmp.lt.u32.totalorder %s577_s30, %s868_s1 }
   0x8   :  { %p583_p2 = pnand %p581_p1, %p578_p0 }
   0xa   :  { %586 = shalt.err (!%p583_p2)
}
   0xb   :  { %s587_s12 = scalar_lea.vmem %s34_s25, 512  ;;  %p592_p4 = scmp.lt.s32.totalorder %s34_s25, %s34_s25 }
   0xc   :  { %p588_p3 = scmp.ne.s32.totalorder %s34_s25, %s587_s12  ;;  %p593_p5 = scmp.lt.s32.totalorder %s587_s12, %s587_s12 }
   0xe   :  { %p594_p6 = por %p593_p5, %p592_p4 }
  0x10   :  { %p595_p7 = pnand %p594_p6, %p588_p3 }
  0x12   :  { %598 = shalt.err (!%p595_p7)
}
  0x13   :  { %s697_s13 = smov 64   ;;  %s698_s14 = smov 4  }
  0x14   :  { %39 = dma.hbm_to_vmem [thread:$0]  %s868_s1, 512, %s34_s25, [#allocation6], %s697_s13, %s697_s13, %s698_s14  }
  0x15   :  { %s599_s19 = scalar_lea.hbm %s867_s0, 128 }
  0x16   :  { %p600_p8 = scmp.ne.s32.totalorder %s867_s0, %s599_s19  ;;  %p603_p9 = scmp.lt.u32.totalorder %s599_s19, %s867_s0 }
  0x18   :  { %p605_p10 = pnand %p603_p9, %p600_p8 }
  0x1a   :  { %608 = shalt.err (!%p605_p10)
}
  0x1b   :  { %s609_s24 = scalar_lea.vmem %s746_s27, 128  ;;  %p614_p12 = scmp.lt.s32.totalorder %s746_s27, %s746_s27 }
  0x1c   :  { %p610_p11 = scmp.ne.s32.totalorder %s746_s27, %s609_s24  ;;  %p615_p13 = scmp.lt.s32.totalorder %s609_s24, %s609_s24 }
  0x1e   :  { %p616_p0 = por %p615_p13, %p614_p12 }
  0x20   :  { %p617_p1 = pnand %p616_p0, %p610_p11 }
  0x22   :  { %620 = shalt.err (!%p617_p1)
}
  0x23   :  { %27 = dma.hbm_to_vmem [thread:$0]  %s867_s0, 128, %s746_s27, [#allocation3], %s697_s13, %s697_s13, %s698_s14  }
  0x24   :  { %s699_s26 = smov [#allocation7]   ;;  %s700_s29 = smov [#allocation8]  }
  0x25   :  { %s47_s28 = sshll.u32 %s699_s26, 4  ;;  %s61_s30 = sshll.u32 %s700_s29, 4  ;;  %s48_s28 = int_to_ptr.vmem [resolvable:$true] %s47_s28  ;;  %s783_s30 = int_to_ptr.vmem [resolvable:$true] %s61_s30 }
  0x26   :  { %s621_s10 = scalar_lea.hbm %s870_s3, 1024 }
  0x27   :  { %p622_p2 = scmp.ne.s32.totalorder %s870_s3, %s621_s10  ;;  %p625_p3 = scmp.lt.u32.totalorder %s621_s10, %s870_s3 }
  0x29   :  { %p627_p4 = pnand %p625_p3, %p622_p2 }
  0x2b   :  { %630 = shalt.err (!%p627_p4)
}
  0x2c   :  { %s631_s0 = scalar_lea.vmem %s48_s28, 1024  ;;  %p636_p6 = scmp.lt.s32.totalorder %s48_s28, %s48_s28 }
  0x2d   :  { %p632_p5 = scmp.ne.s32.totalorder %s48_s28, %s631_s0  ;;  %p637_p7 = scmp.lt.s32.totalorder %s631_s0, %s631_s0 }
  0x2f   :  { %p638_p8 = por %p637_p7, %p636_p6 }
  0x31   :  { %p639_p9 = pnand %p638_p8, %p632_p5 }
  0x33   :  { %642 = shalt.err (!%p639_p9)
}
  0x34   :  { %53 = dma.hbm_to_vmem [thread:$0]  %s870_s3, 1024, %s48_s28, [#allocation6], %s697_s13, %s697_s13, %s698_s14  }
  0x35   :  { %s643_s20 = scalar_lea.hbm %s872_s5, 1024 }
  0x36   :  { %p644_p10 = scmp.ne.s32.totalorder %s872_s5, %s643_s20  ;;  %p647_p11 = scmp.lt.u32.totalorder %s643_s20, %s872_s5 }
  0x38   :  { %p649_p12 = pnand %p647_p11, %p644_p10 }
  0x3a   :  { %652 = shalt.err (!%p649_p12)
}
  0x3b   :  { %s653_s1 = scalar_lea.vmem %s783_s30, 1024  ;;  %p658_p0 = scmp.lt.s32.totalorder %s783_s30, %s783_s30 }
  0x3c   :  { %p654_p13 = scmp.ne.s32.totalorder %s783_s30, %s653_s1  ;;  %p659_p1 = scmp.lt.s32.totalorder %s653_s1, %s653_s1 }
  0x3e   :  { %p660_p2 = por %p659_p1, %p658_p0 }
  0x40   :  { %p661_p3 = pnand %p660_p2, %p654_p13 }
  0x42   :  { %664 = shalt.err (!%p661_p3)
}
  0x43   :  { %67 = dma.hbm_to_vmem [thread:$0]  %s872_s5, 1024, %s783_s30, [#allocation9], %s697_s13, %s697_s13, %s698_s14  }
  0x44   :  { %687 = dma.done.wait [#allocation3], 128  }
  0x45   :  { %688 = vsyncadd [#allocation3], 4294967168 }
  0x46   :  { %689 = dma.done.wait [#allocation6], 1536  }
  0x47   :  { %690 = vsyncadd [#allocation6], 4294965760 }
  0x48   :  { %691 = dma.done.wait [#allocation9], 1024  }
  0x49   :  { %692 = vsyncadd [#allocation9], 4294966272  ;;  %v701_v0 = vmov 0.0   ;;  %vm702_vm0 = vmmov 0   ;;  %v548_v1 = vld [vmem:[#allocation5] sm:$0xff]   ;;  %v549_v2 = vld [vmem:[#allocation5 + $0x8] sm:$0xff]  }
  0x4a   :  { %485 = vmatprep.subr.bf16.mxu0 %v701_v0  ;;  %493 = vmatprep.mubr.msk.bf16.mxu0 %vm702_vm0, %v701_v0  ;;  %v553_v3 = vld [vmem:[#allocation7] sm:$0xff]   ;;  %v550_v4 = vld [vmem:[#allocation5 + $0x10] sm:$0xff]   ;;  %v554_v5 = vld [vmem:[#allocation7 + $0x8] sm:$0xff]   ;;  %vm129_vm1 = vcmask 523264   ;;  %s703_s28 = smov [#allocation10]  }
  0x4b   :  { %497 = vmatprep.subr.bf16.mxu1 %v701_v0  ;;  %513 = vmatprep.mubr.msk.bf16.mxu1 %vm702_vm0, %v701_v0  ;;  %v551_v6 = vld [vmem:[#allocation5 + $0x18] sm:$0xff]   ;;  %v555_v8 = vld [vmem:[#allocation7 + $0x10] sm:$0xff]   ;;  %v557_v10 = vld [vmem:[#allocation7 + $0x20] sm:$0xff]   ;;  %s421_s29 = sshll.u32 %s703_s28, 4  ;;  %s422_s29 = int_to_ptr.vmem [resolvable:$true] %s421_s29 }
  0x4c   :  { %486 = vmatpush3.bf16.msra.mxu0 %v548_v1  ;;  %498 = vmatpush3.bf16.msra.mxu1 %v553_v3  ;;  %v552_v7 = vld [vmem:[#allocation2] sm:$0xff]   ;;  %v558_v11 = vld [vmem:[#allocation7 + $0x28] sm:$0xff]   ;;  %v559_v12 = vld [vmem:[#allocation7 + $0x30] sm:$0xff]   ;;  %s665_s30 = scalar_lea.vmem %s422_s29, 256  ;;  %p670_p5 = scmp.lt.s32.totalorder %s422_s29, %s422_s29 }
  0x4d   :  { %487 = vmatprep.subr.bf16.mxu0 %v701_v0  ;;  %499 = vmatprep.subr.bf16.mxu1 %v701_v0  ;;  %v556_v9 = vld [vmem:[#allocation7 + $0x18] sm:$0xff]   ;;  %v561_v24 = vld [vmem:[#allocation8] sm:$0xff]   ;;  %v562_v25 = vld [vmem:[#allocation8 + $0x8] sm:$0xff]   ;;  %p666_p4 = scmp.ne.s32.totalorder %s422_s29, %s665_s30  ;;  %p671_p6 = scmp.lt.s32.totalorder %s665_s30, %s665_s30 }
  0x4e   :  { %v560_v13 = vld [vmem:[#allocation7 + $0x38] sm:$0xff]   ;;  %v563_v26 = vld [vmem:[#allocation8 + $0x10] sm:$0xff]   ;;  %v565_v28 = vld [vmem:[#allocation8 + $0x20] sm:$0xff]  }
  0x4f   :  { %v435_v14 = vld [vmem:[%s869_s2] ss:$0 sm:$0xff]  ;;  %v566_v29 = vld [vmem:[#allocation8 + $0x28] sm:$0xff]   ;;  %v567_v30 = vld [vmem:[#allocation8 + $0x30] sm:$0xff]   ;;  %p672_p7 = por %p671_p6, %p670_p5 }
  0x50   :  { %488 = vmatpush3.bf16.msra.mxu0 %v549_v2  ;;  %500 = vmatpush3.bf16.msra.mxu1 %v554_v5  ;;  %v564_v27 = vld [vmem:[#allocation8 + $0x18] sm:$0xff]  }
  0x51   :  { %489 = vmatprep.subr.bf16.mxu0 %v701_v0  ;;  %501 = vmatprep.subr.bf16.mxu1 %v701_v0  ;;  %v568_v31 = vld [vmem:[#allocation8 + $0x38] sm:$0xff]   ;;  %p673_p8 = pnand %p672_p7, %p666_p4 }
  0x52   :  { %v442_v32 = vld [vmem:[%s871_s4] ss:$0 sm:$0xff] }
  0x53   :  { %v453_v48 = vld [vmem:[%s873_s6] ss:$0 sm:$0xff] }
  0x54   :  { %490 = vmatpush3.bf16.msra.mxu0 %v550_v4  ;;  %502 = vmatpush3.bf16.msra.mxu1 %v555_v8 }
  0x55   :  { %491 = vmatprep.subr.bf16.mxu0 %v701_v0  ;;  %503 = vmatprep.subr.bf16.mxu1 %v701_v0 }
  0x58   :  { %492 = vmatpush3.bf16.msra.mxu0 %v551_v6  ;;  %504 = vmatpush3.bf16.msra.mxu1 %v556_v9 }
  0x59   :  { %517 = vmatprep.subr.bf16.mxu0 %v701_v0  ;;  %505 = vmatprep.subr.bf16.mxu1 %v701_v0 }
  0x5b   :  { %494 = vmatmul.mubr.msk.bf16.vlgmr.msra.gmra.mrb[0].mxu0 %vm129_vm1, %v552_v7 }
  0x5c   :  { %533 = vmatprep.mubr.msk.bf16.mxu0 %vm702_vm0, %v701_v0  ;;  %506 = vmatpush3.bf16.msra.mxu1 %v557_v10 }
  0x5d   :  { %507 = vmatprep.subr.bf16.mxu1 %v701_v0  ;;  %518 = vmatpush3.bf16.msra.mxu0 %v561_v24 }
  0x5e   :  { %519 = vmatprep.subr.bf16.mxu0 %v701_v0 }
  0x60   :  { %508 = vmatpush3.bf16.msra.mxu1 %v558_v11 }
  0x61   :  { %509 = vmatprep.subr.bf16.mxu1 %v701_v0  ;;  %520 = vmatpush3.bf16.msra.mxu0 %v562_v25 }
  0x62   :  { %521 = vmatprep.subr.bf16.mxu0 %v701_v0 }
  0x64   :  { %510 = vmatpush3.bf16.msra.mxu1 %v559_v12 }
  0x65   :  { %511 = vmatprep.subr.bf16.mxu1 %v701_v0  ;;  %522 = vmatpush3.bf16.msra.mxu0 %v563_v26 }
  0x66   :  { %523 = vmatprep.subr.bf16.mxu0 %v701_v0 }
  0x68   :  { %512 = vmatpush3.bf16.msra.mxu1 %v560_v13 }
  0x69   :  { %524 = vmatpush3.bf16.msra.mxu0 %v564_v27 }
  0x6a   :  { %525 = vmatprep.subr.bf16.mxu0 %v701_v0 }
  0x6d   :  { %526 = vmatpush3.bf16.msra.mxu0 %v565_v28 }
  0x6e   :  { %527 = vmatprep.subr.bf16.mxu0 %v701_v0 }
  0x71   :  { %528 = vmatpush3.bf16.msra.mxu0 %v566_v29 }
  0x72   :  { %529 = vmatprep.subr.bf16.mxu0 %v701_v0 }
  0x75   :  { %530 = vmatpush3.bf16.msra.mxu0 %v567_v30 }
  0x76   :  { %531 = vmatprep.subr.bf16.mxu0 %v701_v0 }
  0x79   :  { %532 = vmatpush3.bf16.msra.mxu0 %v568_v31 }
 0x12e   :  { %v167_v15 = vpop.f32.mrb[0].mxu0 }
 0x12f   :  { %v168_v16 = vadd.f32 %v435_v14, %v167_v15  ;;  %v495_v17 = vpop.f32.mrb[1].mxu0 }
 0x130   :  { %v170_v18 = vpop.f32.mrb[2].mxu0 }
 0x131   :  { %v171_v19 = vadd.f32 %v435_v14, %v170_v18  ;;  %v496_v20 = vpop.f32.mrb[3].mxu0  ;;  %v174_v21 = vmax.f32 %v168_v16, 0.0 }
 0x133   :  { %v175_v22 = vmax.f32 %v171_v19, 0.0 }
 0x135   :  { %v176_v23 = vpack.c.bf16 %v175_v22, %v174_v21 }
 0x137   :  { %514 = vmatmul.mubr.bf16.vlgmr.msra.gmra.mrb[0].mxu1 %v176_v23 }
 0x20a   :  { %v282_v33 = vpop.f32.mrb[0].mxu1 }
 0x20b   :  { %v283_v34 = vadd.f32 %v442_v32, %v282_v33  ;;  %v515_v35 = vpop.f32.mrb[1].mxu1 }
 0x20c   :  { %v285_v36 = vpop.f32.mrb[2].mxu1 }
 0x20d   :  { %v451_v37 = vmul.f32 -1.442695, %v283_v34  ;;  %v286_v38 = vadd.f32 %v442_v32, %v285_v36  ;;  %v516_v39 = vpop.f32.mrb[3].mxu1 }
 0x20f   :  { %569 = vpow2.f32 %v451_v37  ;;  %v452_v40 = vmul.f32 -1.442695, %v286_v38 }
 0x211   :  { %571 = vpow2.f32 %v452_v40 }
 0x219   :  { %v570_v41 = vpop.eup %569 }
 0x21a   :  { %v295_v42 = vadd.f32 1.0, %v570_v41 }
 0x21b   :  { %v572_v43 = vpop.eup %571 }
 0x21c   :  { %v296_v44 = vadd.f32 1.0, %v572_v43  ;;  %573 = vrcp.f32 %v295_v42 }
 0x21e   :  { %575 = vrcp.f32 %v296_v44 }
 0x226   :  { %v574_v45 = vpop.eup %573 }
 0x228   :  { %v576_v46 = vpop.eup %575 }
 0x229   :  { %v301_v47 = vpack.c.bf16 %v576_v46, %v574_v45 }
 0x22b   :  { %534 = vmatmul.mubr.bf16.vlgmr.msra.gmra.mrb[4].mxu0 %v301_v47 }
 0x2fe   :  { %v407_v49 = vpop.f32.mrb[4].mxu0 }
 0x2ff   :  { %v408_v50 = vadd.f32 %v453_v48, %v407_v49  ;;  %v535_v51 = vpop.f32.mrb[5].mxu0 }
 0x300   :  { %v410_v52 = vpop.f32.mrb[6].mxu0 }
 0x301   :  { %414 = vst [vmem:[#allocation10] sm:$0xff] %v408_v50  ;;  %v411_v53 = vadd.f32 %v453_v48, %v410_v52  ;;  %v536_v54 = vpop.f32.mrb[7].mxu0 }
 0x303   :  { %415 = vst [vmem:[#allocation10 + $0x8] sm:$0xff] %v411_v53 }
 0x304   :  { %676 = shalt.err (!%p673_p8)
}
 0x305   :  { %s677_s9 = scalar_lea.hbm %s874_s7, 256 }
 0x306   :  { %p678_p9 = scmp.ne.s32.totalorder %s874_s7, %s677_s9  ;;  %p681_p10 = scmp.lt.u32.totalorder %s677_s9, %s874_s7 }
 0x308   :  { %p683_p11 = pnand %p681_p10, %p678_p9 }
 0x30a   :  { %686 = shalt.err (!%p683_p11)
}
 0x30b   :  { %s704_s16 = smov 128   ;;  %s705_s0 = smov 8  }
 0x30c   :  { %427 = dma.vmem_to_hbm [thread:$0]  %s422_s29, 256, %s874_s7, [#allocation4], %s704_s16, %s704_s16, %s705_s0  }
 0x30d   :  { %693 = dma.done.wait [#allocation4], 256  }
 0x30e   :  { %694 = vsyncadd [#allocation4], 4294967040 }
 0x30f   :  { %431 = vsyncpa [#allocation3], 1 }
 0x310   :  { %432 = vsyncpa [#allocation6], 1 }
 0x311   :  { %433 = vsyncpa [#allocation9], 1 }
 0x312   :  { %434 = vsyncpa [#allocation4], 1 }

</bundles_post_ra>
